<compile_context>
chip_gen: v7x
topology: tpu7x:2x2x1
jax: 0.10.0
libtpu: 0.0.40
codegen_flags: <defaults>
</compile_context>

<pallas_src>
import functools

import jax
import jax.numpy as jnp
from jax import lax
from jax.experimental import pallas as pl
from jax.experimental.pallas import tpu as pltpu

LAMBDA_ = 0.00177
LOSS_WEIGHT = 1.0


def _round_up(x, m):
    return ((x + m - 1) // m) * m


def eql_kernel(label_ref, thresh_ref, cls_ref, part_ref, *, n_total, c_total):
    i = pl.program_id(0)

    x = cls_ref[...].astype(jnp.float32)          # (TR, CP)
    labels = label_ref[...]                       # (TR, 1) int32
    thresh = thresh_ref[...]                      # (1, CP) f32 == (freq < lambda)
    tr, cp = x.shape

    col = lax.broadcasted_iota(jnp.int32, (tr, cp), 1)

    # expand_label: one_hot(label, C+1)[:, :C]  ->  (col == label); the
    # background column (col == C) can only appear in the padded lane region
    # and is removed by the last-chunk mask below.
    target = col == labels                        # bool (TR, CP)

    # exclude_func: rows whose label == bg index (== C) are excluded.
    exclude = (labels != c_total).astype(jnp.float32)            # (TR, 1)
    # eql_w restricted to the target==0 entries (it is exactly 1 on target==1).
    neg_w = 1.0 - exclude * thresh                               # (TR, CP)

    # gumbel branch; 3 transcendentals per element instead of 4:
    #   log(p) = log(exp(-exp(-xc))) = -exp(-xc) = -e  (exact; clamp at -100
    #   can never trigger because xc in [-4, 10] -> e in [4.5e-5, 54.6]).
    xc = jnp.clip(x, -4.0, 10.0)
    e = jnp.exp(-xc)                              # EUP #1
    p = jnp.exp(-e)                               # EUP #2  (pestim)
    neg_log_1mp = -jnp.maximum(jnp.log(1.0 - p), -100.0)         # EUP #3

    # bce * eql_w, exploiting the one-hot structure of target.
    contrib = jnp.where(target, e, neg_w * neg_log_1mp)

    # Lane fold, 128 columns at a time (pure VPU; slices sit on vreg tile
    # boundaries).  Padded classes only exist in the final chunk, so only it
    # needs a mask — and only when C is not a multiple of 128 (static check).
    chunks = [contrib[:, j * 128:(j + 1) * 128] for j in range(cp // 128)]
    if c_total % 128 != 0:
        col_last = lax.broadcasted_iota(jnp.int32, (tr, 128), 1) + (cp - 128)
        chunks[-1] = jnp.where(col_last < c_total, chunks[-1], 0.0)
    folded = chunks[0]
    for ch in chunks[1:]:
        folded = folded + ch                                     # (TR, 128)

    # Row (N) padding: mask after the lane fold (row-constant), and only when
    # padded rows can exist at all (static check on the padded layout).
    if n_total % tr != 0:
        row = lax.broadcasted_iota(jnp.int32, (tr, 1), 0) + i * tr
        folded = jnp.where(row < n_total, folded, 0.0)

    # Sublane fold to an (8, 128) partial; the single cross-lane reduction
    # happens once, in the wrapper.
    part = folded[0:8, :]
    for r in range(1, tr // 8):
        part = part + folded[r * 8:(r + 1) * 8, :]
    part_ref[...] = part


def eql_loss(cls_score, label, freq_info, *, tile_rows=256,
             lambda_=LAMBDA_, loss_weight=LOSS_WEIGHT):
    """cls_score: (N, C) float, label: (N,) int in [0, C], freq_info: (C,) float."""
    n, c = cls_score.shape
    c_pad = _round_up(c, 128)
    tr = min(_round_up(tile_rows, 8), _round_up(n, 8))
    n_pad = _round_up(n, tr)
    num_tiles = n_pad // tr

    x = cls_score
    if (n_pad, c_pad) != (n, c):
        x = jnp.pad(x, ((0, n_pad - n), (0, c_pad - c)))
    # Padded rows get the background label (they are also row-masked in-kernel).
    lab = jnp.pad(label.astype(jnp.int32), (0, n_pad - n),
                  constant_values=c).reshape(n_pad, 1)
    # threshold_func precomputed once; pad classes get 0 (masked in-kernel anyway).
    thresh = jnp.pad((freq_info.astype(jnp.float32) < lambda_).astype(jnp.float32),
                     (0, c_pad - c)).reshape(1, c_pad)

    kernel = functools.partial(eql_kernel, n_total=n, c_total=c)

    partials = pl.pallas_call(
        kernel,
        out_shape=jax.ShapeDtypeStruct((num_tiles * 8, 128), jnp.float32),
        grid=(num_tiles,),
        in_specs=[
            pl.BlockSpec((tr, 1), lambda i: (i, 0)),        # labels (per tile)
            pl.BlockSpec((1, c_pad), lambda i: (0, 0)),     # threshold (resident)
            pl.BlockSpec((tr, c_pad), lambda i: (i, 0)),    # cls_score (per tile)
        ],
        out_specs=pl.BlockSpec((8, 128), lambda i: (i, 0)),
        compiler_params=pltpu.CompilerParams(
            dimension_semantics=("parallel",)),
    )(lab, thresh, x)

    total = jnp.sum(partials, dtype=jnp.float32)
    return jnp.float32(loss_weight) * total / jnp.float32(n)


def eql_loss_ref(cls_score, label, freq_info):
    """Plain-JAX reference of the same forward pass (for verification)."""
    n, c = cls_score.shape
    xs = cls_score.astype(jnp.float32)
    target = jax.nn.one_hot(label, c + 1, dtype=jnp.float32)[:, :c]
    exclude = (label != c).astype(jnp.float32)[:, None]
    thresh = (freq_info < LAMBDA_).astype(jnp.float32)[None, :]
    eql_w = 1.0 - exclude * thresh * (1.0 - target)
    xc = jnp.clip(xs, -4.0, 10.0)
    p = jnp.exp(-jnp.exp(-xc))
    bce = -(target * jnp.maximum(jnp.log(p), -100.0)
            + (1.0 - target) * jnp.maximum(jnp.log(1.0 - p), -100.0))
    return LOSS_WEIGHT * jnp.sum(bce * eql_w) / n


if __name__ == "__main__":
    key = jax.random.PRNGKey(0)
    k1, k2, k3, k4, k5, k6 = jax.random.split(key, 6)

    # Case 1: multi-tile grid, row padding (N not a multiple of the tile) and
    # class/lane padding (C not a multiple of 128).
    N1, C1 = 20, 150
    cls1 = 3.0 * jax.random.normal(k1, (N1, C1), dtype=jnp.float32)
    lab1 = jax.random.randint(k2, (N1,), 0, C1 + 1, dtype=jnp.int32)
    freq1 = jnp.linspace(0.0002, 0.01, C1, dtype=jnp.float32)
    out1 = eql_loss(cls1, lab1, freq1, tile_rows=8)
    jax.block_until_ready(out1)
    ref1 = eql_loss_ref(cls1, lab1, freq1)
    assert jnp.allclose(out1, ref1, rtol=1e-4, atol=1e-4), (out1, ref1)

    # Case 2: tiny single-tile case with lane padding only.
    N2, C2 = 8, 16
    cls2 = 3.0 * jax.random.normal(k3, (N2, C2), dtype=jnp.float32)
    lab2 = jax.random.randint(k4, (N2,), 0, C2 + 1, dtype=jnp.int32)
    freq2 = jnp.linspace(0.0002, 0.01, C2, dtype=jnp.float32)
    out2 = eql_loss(cls2, lab2, freq2)
    jax.block_until_ready(out2)
    ref2 = eql_loss_ref(cls2, lab2, freq2)
    assert jnp.allclose(out2, ref2, rtol=1e-4, atol=1e-4), (out2, ref2)

    # Case 3: fully aligned shapes (exercises the mask-free static paths).
    N3, C3 = 16, 256
    cls3 = 3.0 * jax.random.normal(k5, (N3, C3), dtype=jnp.float32)
    lab3 = jax.random.randint(k6, (N3,), 0, C3 + 1, dtype=jnp.int32)
    freq3 = jnp.linspace(0.0002, 0.01, C3, dtype=jnp.float32)
    out3 = eql_loss(cls3, lab3, freq3)
    jax.block_until_ready(out3)
    ref3 = eql_loss_ref(cls3, lab3, freq3)
    assert jnp.allclose(out3, ref3, rtol=1e-4, atol=1e-4), (out3, ref3)

    print("KERNEL_OK")
</pallas_src>

<mosaic_0001>
module attributes {stable_mosaic.version = 11 : i64} {
  func.func @eql_kernel(%arg0: i32, %arg1: memref<8x1xi32, #tpu.memory_space<vmem>>, %arg2: memref<1x256xf32, #tpu.memory_space<vmem>>, %arg3: memref<8x256xf32, #tpu.memory_space<vmem>>, %arg4: memref<8x128xf32, #tpu.memory_space<vmem>>) attributes {dimension_semantics = [#tpu.dimension_semantics<parallel>], iteration_bounds = array<i64: 3>, scalar_prefetch = 0 : i64, scratch_operands = 0 : i64, tpu.core_type = #tpu.core_type<tc>, window_params = [{transform_indices = @transform_0, window_bounds = array<i64: 8, 1>}, {pipeline_mode = #tpu.pipeline_mode<synchronous>, transform_indices = @transform_1, window_bounds = array<i64: 1, 256>}, {transform_indices = @transform_2, window_bounds = array<i64: 8, 256>}, {transform_indices = @transform_3, window_bounds = array<i64: 8, 128>}]} {
    %c0 = arith.constant 0 : index
    %c0_0 = arith.constant 0 : index
    %0 = vector.load %arg3[%c0, %c0_0] : memref<8x256xf32, #tpu.memory_space<vmem>>, vector<8x256xf32>
    %c0_1 = arith.constant 0 : index
    %c0_2 = arith.constant 0 : index
    %1 = vector.load %arg1[%c0_1, %c0_2] : memref<8x1xi32, #tpu.memory_space<vmem>>, vector<8x1xi32>
    %c0_3 = arith.constant 0 : index
    %c0_4 = arith.constant 0 : index
    %2 = vector.load %arg2[%c0_3, %c0_4] : memref<1x256xf32, #tpu.memory_space<vmem>>, vector<1x256xf32>
    %3 = tpu.iota {dimensions = array<i32: 1>} : vector<8x256xi32>
    %4 = vector.broadcast %1 : vector<8x1xi32> to vector<8x256xi32>
    %5 = arith.cmpi eq, %3, %4 : vector<8x256xi32>
    %c150_i32 = arith.constant 150 : i32
    %6 = vector.broadcast %c150_i32 : i32 to vector<8x1xi32>
    %7 = arith.cmpi ne, %1, %6 : vector<8x1xi32>
    %8 = arith.extui %7 : vector<8x1xi1> to vector<8x1xi32>
    %9 = arith.sitofp %8 : vector<8x1xi32> to vector<8x1xf32>
    %10 = vector.broadcast %9 : vector<8x1xf32> to vector<8x256xf32>
    %11 = vector.broadcast %2 : vector<1x256xf32> to vector<8x256xf32>
    %12 = arith.mulf %10, %11 : vector<8x256xf32>
    %cst = arith.constant 1.000000e+00 : f32
    %13 = vector.broadcast %cst : f32 to vector<8x256xf32>
    %14 = arith.subf %13, %12 : vector<8x256xf32>
    %cst_5 = arith.constant -4.000000e+00 : f32
    %cst_6 = arith.constant 1.000000e+01 : f32
    %15 = vector.broadcast %cst_5 : f32 to vector<8x256xf32>
    %16 = arith.maximumf %15, %0 : vector<8x256xf32>
    %17 = vector.broadcast %cst_6 : f32 to vector<8x256xf32>
    %18 = arith.minimumf %17, %16 : vector<8x256xf32>
    %cst_7 = arith.constant 0.000000e+00 : f32
    %19 = vector.broadcast %cst_7 : f32 to vector<8x256xf32>
    %20 = arith.subf %19, %18 : vector<8x256xf32>
    %21 = math.exp %20 : vector<8x256xf32>
    %cst_8 = arith.constant 0.000000e+00 : f32
    %22 = vector.broadcast %cst_8 : f32 to vector<8x256xf32>
    %23 = arith.subf %22, %21 : vector<8x256xf32>
    %24 = math.exp %23 : vector<8x256xf32>
    %cst_9 = arith.constant 1.000000e+00 : f32
    %25 = vector.broadcast %cst_9 : f32 to vector<8x256xf32>
    %26 = arith.subf %25, %24 : vector<8x256xf32>
    %27 = math.log %26 : vector<8x256xf32>
    %cst_10 = arith.constant -1.000000e+02 : f32
    %28 = vector.broadcast %cst_10 : f32 to vector<8x256xf32>
    %29 = arith.maximumf %27, %28 : vector<8x256xf32>
    %cst_11 = arith.constant 0.000000e+00 : f32
    %30 = vector.broadcast %cst_11 : f32 to vector<8x256xf32>
    %31 = arith.subf %30, %29 : vector<8x256xf32>
    %32 = arith.mulf %14, %31 : vector<8x256xf32>
    %33 = arith.select %5, %21, %32 : vector<8x256xi1>, vector<8x256xf32>
    %34 = vector.extract_strided_slice %33 {offsets = [0, 0], sizes = [8, 128], strides = [1, 1]} : vector<8x256xf32> to vector<8x128xf32>
    %35 = vector.extract_strided_slice %33 {offsets = [0, 128], sizes = [8, 128], strides = [1, 1]} : vector<8x256xf32> to vector<8x128xf32>
    %36 = tpu.iota {dimensions = array<i32: 1>} : vector<8x128xi32>
    %c128_i32 = arith.constant 128 : i32
    %37 = vector.broadcast %c128_i32 : i32 to vector<8x128xi32>
    %38 = arith.addi %36, %37 : vector<8x128xi32>
    %c150_i32_12 = arith.constant 150 : i32
    %39 = vector.broadcast %c150_i32_12 : i32 to vector<8x128xi32>
    %40 = arith.cmpi slt, %38, %39 : vector<8x128xi32>
    %cst_13 = arith.constant 0.000000e+00 : f32
    %41 = vector.broadcast %cst_13 : f32 to vector<8x128xf32>
    %42 = arith.select %40, %35, %41 : vector<8x128xi1>, vector<8x128xf32>
    %43 = arith.addf %34, %42 : vector<8x128xf32>
    %44 = tpu.iota {dimensions = array<i32: 0>} : vector<8x1xi32>
    %c8_i32 = arith.constant 8 : i32
    %45 = arith.muli %arg0, %c8_i32 : i32
    %46 = vector.broadcast %45 : i32 to vector<8x1xi32>
    %47 = arith.addi %44, %46 : vector<8x1xi32>
    %c20_i32 = arith.constant 20 : i32
    %48 = vector.broadcast %c20_i32 : i32 to vector<8x1xi32>
    %49 = arith.cmpi slt, %47, %48 : vector<8x1xi32>
    %cst_14 = arith.constant 0.000000e+00 : f32
    %50 = vector.shape_cast %49 : vector<8x1xi1> to vector<8x1xi1>
    %51 = vector.broadcast %50 : vector<8x1xi1> to vector<8x128xi1>
    %52 = vector.broadcast %cst_14 : f32 to vector<8x128xf32>
    %53 = arith.select %51, %43, %52 : vector<8x128xi1>, vector<8x128xf32>
    %c0_15 = arith.constant 0 : index
    %c0_16 = arith.constant 0 : index
    %54 = vector.load %arg4[%c0_15, %c0_16] : memref<8x128xf32, #tpu.memory_space<vmem>>, vector<8x128xf32>
    tpu.vector_store %arg4[%c0_15, %c0_16], %53 {strides = array<i32>} : memref<8x128xf32, #tpu.memory_space<vmem>>, vector<8x128xf32>,
    return
  }
  func.func @transform_0(%arg0: i32) -> (i32, i32) {
    %c0_i32 = arith.constant 0 : i32
    %c0_i32_0 = arith.constant 0 : i32
    return %arg0, %c0_i32 : i32, i32
  }
  func.func @transform_1(%arg0: i32) -> (i32, i32) {
    %c0_i32 = arith.constant 0 : i32
    %c0_i32_0 = arith.constant 0 : i32
    %c0_i32_1 = arith.constant 0 : i32
    return %c0_i32, %c0_i32_0 : i32, i32
  }
  func.func @transform_2(%arg0: i32) -> (i32, i32) {
    %c0_i32 = arith.constant 0 : i32
    %c0_i32_0 = arith.constant 0 : i32
    return %arg0, %c0_i32 : i32, i32
  }
  func.func @transform_3(%arg0: i32) -> (i32, i32) {
    %c0_i32 = arith.constant 0 : i32
    %c0_i32_0 = arith.constant 0 : i32
    return %arg0, %c0_i32 : i32, i32
  }
}

</mosaic_0001>

<bundles_post_ra>
// kernel: tpu_custom_call.1
= control target key start
LH: loop header
LB: loop body
LE: loop exit
PB: predicated region body
PF: predicated region fallthrough
CT: control target
= control target key end

     0   :  { %8 = vsyncpa [#allocation3], 0  ;;  %s747_s0 = inlined_call_operand.vmem [shape: s32[24,1], index: 0, kind: input, shape index: {}]   ;;  %s748_s1 = inlined_call_operand.vmem [shape: f32[1,256], index: 1, kind: input, shape index: {}]   ;;  %s749_s2 = inlined_call_operand.hbm [shape: f32[24,256], index: 2, kind: input, shape index: {}]   ;;  %s750_s3 = inlined_call_operand.hbm [shape: f32[24,128], index: 3, kind: output, shape index: {}]  }
   0x1   :  { %10 = vsyncpa [#allocation3 + $0x1], 0 }
   0x2   :  { %11 = vsyncpa [#allocation4], 0 }
   0x3   :  { %13 = vsyncpa [#allocation4 + $0x1], 0  ;;  %s578_s12 = smov 0   ;;  %s580_s13 = smov 0  }
   0x4   :  { %s582_s14 = smov 0   ;;  %s584_s15 = smov 0  }
   0x5 LB: > { %s599_s16 = sadd.s32 4294967295, %s552_s15   ;;  %s378_s17 = sadd.s32 4294967294, %s552_s15   ;;  %s552_s15 = sphi %s584_s15, %s764_s15   ;;  %s548_s14 = sphi %s582_s14, %s763_s14   ;;  %s544_s13 = sphi %s580_s13, %s762_s13   ;;  %s540_s12 = sphi %s578_s12, %s761_s12  }
   0x6   : > { %s603_s18 = sadd.s32 1, %s552_s15   ;;  %s73_s19 = sadd.s32 1, %s548_s14 }
   0x7   : > { %s70_s20 = ssub.s32 %s552_s15, %s603_s18  ;;  %p80_p0 = scmp.ne.s32.totalorder %s548_s14, %s544_s13 }
   0x8   : > { %p71_p1 = scmp.eq.s32.totalorder %s70_s20, 0  ;;  %p81_p2 = scmp.eq.s32.totalorder %s552_s15, 0 }
   0x9   : > { %p86_p3 = scmp.ne.s32.totalorder %s544_s13, %s540_s12  ;;  %p87_p4 = scmp.eq.s32.totalorder %s599_s16, 0 }
   0xa   : > { %s615_s21 = scalar_select %p71_p1, %s548_s14, %s73_s19  }
   0xb   : > { %p617_p5 = por %p81_p2, %p80_p0  ;;  %p621_p6 = por %p87_p4, %p86_p3 }
   0xc   : > { %p110_p7 = scmp.eq.s32.totalorder %s599_s16, 2  ;;  %p116_p8 = scmp.eq.s32.totalorder %s378_s17, 2 }
   0xd   : > { %p407_p9 = scmp.lt.s32.totalorder %s552_s15, 3  ;;  %s146_s26 = sand.u32 1, %s548_s14  }
   0xe   : > { %p627_p10 = por %p110_p7, %p80_p0  ;;  %p631_p11 = por %p116_p8, %p86_p3 }
   0xf   : > { %s394_s27 = sshll.u32 %s552_s15, 8  ;;  %s381_s28 = sshll.u32 %s146_s26, 4 }
  0x10   : > { %s754_s24 = scalar_select %p627_p10, 1, 0 }
  0x11   : > { %s755_s25 = scalar_select %p631_p11, 1, 0 }
  0x12   : > { %s640_s4 = scalar_lea.hbm %s749_s2, %s394_s27  ;;  %s150_s5 = scalar_lea.vmem [#allocation2], %s381_s28 }
  0x13   : > { %s158_s6 = sshll.u32 %s150_s5, 4  ;;  %p644_p12 = pnand %p407_p9, %p617_p5  ;;  %s648_s6 = int_to_ptr.vmem [resolvable:$true] %s158_s6 }
  0x14   : > { %s147_s8 = scalar_lea.sflag [#allocation3], %s146_s26  ;;  %s456_s9 = scalar_lea.hbm %s640_s4, 256 }
  0x15   : > { %p457_p1 = scmp.ne.s32.totalorder %s640_s4, %s456_s9  ;;  %p458_p2 = pneg %p644_p12 }
  0x16   : > { %s461_s17 = scalar_lea.hbm %s749_s2, 768  ;;  %p462_p5 = scmp.lt.u32.totalorder %s640_s4, %s749_s2 }
  0x17   : > { %p459_p3 = pnand %p458_p2, %p457_p1  ;;  %p463_p7 = scmp.lt.u32.totalorder %s461_s17, %s456_s9 }
  0x18   : > { %p465_p9 = scmp.lt.u32.totalorder %s456_s9, %s640_s4 }
  0x19   : > { %p460_p4 = pneg %p459_p3  ;;  %p464_p8 = por %p463_p7, %p462_p5 }
  0x1b   : > { %p466_p13 = por %p465_p9, %p464_p8 }
  0x1d   : > { %p467_p0 = pnand %p466_p13, %p460_p4 }
  0x1f   : > { %470 = shalt.err (!%p467_p0)
}
  0x20   : > { %s471_s22 = scalar_lea.vmem %s648_s6, 256  ;;  %s554_s26 = smov [#allocation2]  }
  0x21   : > { %p472_p1 = scmp.ne.s32.totalorder %s648_s6, %s471_s22  ;;  %s476_s27 = sshll.u32 %s554_s26, 4  ;;  %s477_s27 = int_to_ptr.vmem [resolvable:$false] %s476_s27 }
  0x22   : > { %s478_s28 = scalar_lea.vmem %s477_s27, 512  ;;  %p479_p10 = scmp.lt.s32.totalorder %s648_s6, %s477_s27 }
  0x23   : > { %p474_p3 = pnand %p472_p1, %p458_p2  ;;  %p480_p5 = scmp.lt.s32.totalorder %s478_s28, %s471_s22 }
  0x25   : > { %p475_p11 = pneg %p474_p3  ;;  %p481_p7 = por %p480_p5, %p479_p10 }
  0x27   : > { %p482_p8 = pnand %p481_p7, %p475_p11 }
  0x29   : > { %485 = shalt.err (!%p482_p8)
}
  0x2a   : > { %402 = dma.hbm_to_vmem [thread:$0]  (!%p644_p12), %s640_s4, 256, %s648_s6, %s147_s8  }
  0x2b   : > { %p757_p13 = scmp.lt.s32.totalorder %s552_s15, 4  ;;  %p758_p0 = scmp.ge.s32.totalorder %s552_s15, 1 }
  0x2d   : > { %p164_p2 = pnand %p758_p0, %p757_p13 }
  0x2e   : > { %s682_s29 = sand.u32 (!%p164_p2), 1, %s544_s13  }
  0x2f   : > { %167 = sbr.rel (%p164_p2) target bundleno = 217 (0xd9), region = 32  ;;  %s385_s30 = sshll.u32 (!%p164_p2), %s682_s29, 4 }
  0x30   : > { %s170_s5 = scalar_lea.sflag (!%p164_p2), [#allocation3], %s682_s29  ;;  %s173_s9 = scalar_lea.vmem (!%p164_p2), [#allocation2], %s385_s30 }
  0x36   : > { %531 = dma.done.wait (%p621_p6), %s170_s5, 256  }
  0x37   : > { %533 = vsyncadd (%p621_p6), %s170_s5, 4294967040  ;;  %p200_p10 = scmp.lt.s32.totalorder %s599_s16, 2  ;;  %v555_v0 = vmov 0   ;;  %v556_v2 = vmov 0.0   ;;  %v204_v4 = vld [vmem:[%s173_s9] sm:$0xff]  ;;  %v205_v5 = vld [vmem:[%s173_s9 + $0x8] sm:$0xff]  ;;  %v208_v24 = vlaneseq }
  0x38   : > { %443 = vset.pattern.permute.xlu0 %v555_v0  ;;  %v239_v6 = vmax.f32 %v204_v4, -4.0  ;;  %v240_v7 = vmax.f32 %v205_v5, -4.0  ;;  %v207_v32 = vld [vmem:[%s748_s1] sm:$0x3]  ;;  %s389_s17 = sshll.u32 %s599_s16, 3  ;;  %s386_s19 = sshll.u32 %s682_s29, 3 }
  0x39   : > { %s201_s4 = scalar_select %p200_p10, %s599_s16, 2  ;;  %v226_v26 = vshrl.u32 %v208_v24, 7  ;;  %v209_v33 = vand.u32 127, %v208_v24  ;;  %v275_v40 = vstv %s389_s17 }
  0x3a   : > { %v241_v8 = vmin.f32 %v239_v6, 10.0  ;;  %v242_v9 = vmin.f32 %v240_v7, 10.0  ;;  %s391_s20 = sshll.u32 %s599_s16, 7  ;;  %s199_s22 = scalar_lea.vmem [#allocation5], %s386_s19 }
  0x3b   : > { %s387_s6 = sshll.u32 %s201_s4, 3  ;;  %v227_v28 = vsub.s32 0, %v226_v26  ;;  %v231_v29 = vsub.s32 1, %v226_v26  ;;  %v210_v39 = vadd.s32 128, %v209_v33  ;;  %v276_v47 = vadd.s32 %v275_v40, %v226_v26  ;;  %s296_s26 = sshll.u32 %s199_s22, 4  ;;  %s706_s26 = int_to_ptr.vmem [resolvable:$true] %s296_s26 }
  0x3c   : > { %s203_s10 = scalar_lea.vmem %s747_s0, %s387_s6  ;;  %v243_v10 = vsub.f32 0.0, %v241_v8  ;;  %v244_v11 = vsub.f32 0.0, %v242_v9  ;;  %s704_s30 = scalar_lea.hbm %s750_s3, %s391_s20 }
  0x3d   : > { %v206_v1 = vld [vmem:[%s203_s10] sm:$0xff]  ;;  %v228_v34 = vrot.slane %v207_v32, %v227_v28  ;;  %v232_v35 = vrot.slane %v207_v32, %v231_v29  ;;  %vm269_vm1 = vcmp.lt.s32.totalorder %v210_v39, 150  ;;  %vm277_vm4 = vcmp.lt.s32.totalorder %v276_v47, 20  ;;  %s283_s5 = scalar_lea.sflag [#allocation4], %s682_s29  ;;  %s486_s9 = scalar_lea.vmem %s706_s26, 128 }
  0x3e   : > { %vm216_vm0 = vcmp.ne.s32.totalorder %v206_v1, 150  ;;  %v245_v12 = vmul.f32 1.442695, %v243_v10  ;;  %v247_v13 = vmul.f32 1.442695, %v244_v11  ;;  %p487_p6 = scmp.ne.s32.totalorder %s706_s26, %s486_s9  ;;  %p759_p11 = scmp.ne.s32.totalorder %s754_s24, 0 }
  0x3f   : > { %v388_v3 = vsel %vm216_vm0, 1.0, %v556_v2  ;;  %s557_s16 = smov [#allocation5]  }
  0x40   : > { %221 = vperm.xlu0 %443, %v388_v3   ;;  %444 = vpow2.f32 %v245_v12  ;;  %p488_p12 = pnand %p487_p6, %p759_p11  ;;  %s490_s4 = sshll.u32 %s557_s16, 4  ;;  %s491_s4 = int_to_ptr.vmem [resolvable:$false] %s490_s4 }
  0x41   : > { %446 = vpow2.f32 %v247_v13  ;;  %s492_s6 = scalar_lea.vmem %s491_s4, 256  ;;  %p493_p9 = scmp.lt.s32.totalorder %s706_s26, %s491_s4 }
  0x42   : > { %p489_p4 = pneg %p488_p12  ;;  %p494_p1 = scmp.lt.s32.totalorder %s492_s6, %s486_s9 }
  0x44   : > { %212 = vperm.xlu0 %443, %v206_v1   ;;  %p495_p3 = por %p494_p1, %p493_p9 }
  0x46   : > { %p496_p5 = pnand %p495_p3, %p489_p4 }
  0x4a   : > { %v445_v14 = vpop.eup %444 }
  0x4b   : > { %v447_v15 = vpop.eup %446  ;;  %v249_v16 = vsub.f32 0.0, %v445_v14 }
  0x4c   : > { %v250_v17 = vsub.f32 0.0, %v447_v15 }
  0x4d   : > { %v251_v18 = vmul.f32 1.442695, %v249_v16 }
  0x4e   : > { %v253_v19 = vmul.f32 1.442695, %v250_v17 }
  0x4f   : > { %448 = vpow2.f32 %v251_v18 }
  0x50   : > { %450 = vpow2.f32 %v253_v19 }
  0x59   : > { %v449_v20 = vpop.eup %448 }
  0x5a   : > { %v451_v21 = vpop.eup %450  ;;  %v255_v22 = vsub.f32 1.0, %v449_v20 }
  0x5b   : > { %v256_v23 = vsub.f32 1.0, %v451_v21 }
  0x5c   : > { %452 = vlog2.f32 %v255_v22 }
  0x5d   : > { %454 = vlog2.f32 %v256_v23 }
  0x66   : > { %v453_v25 = vpop.eup %452 }
  0x67   : > { %v455_v27 = vpop.eup %454  ;;  %v258_v30 = vmul.f32 0.6931472, %v453_v25 }
  0x68   : > { %v260_v31 = vmul.f32 0.6931472, %v455_v27 }
  0x69   : > { %v261_v36 = vmax.f32 %v258_v30, -100.0 }
  0x6a   : > { %v262_v37 = vmax.f32 %v260_v31, -100.0 }
  0x6b   : > { %v263_v43 = vsub.f32 0.0, %v261_v36 }
  0x6c   : > { %v264_v44 = vsub.f32 0.0, %v262_v37 }
  0xbf   : > { %v222_v38 = vpop.permute.xlu0 %221 }
  0xc0   : > { %v235_v41 = vmul.f32 %v228_v34, %v222_v38  ;;  %v236_v42 = vmul.f32 %v232_v35, %v222_v38 }
  0xc2   : > { %v237_v45 = vsub.f32 1.0, %v235_v41  ;;  %v238_v46 = vsub.f32 1.0, %v236_v42 }
  0xc3   : > { %v213_v48 = vpop.permute.xlu0 %212 }
  0xc4   : > { %v265_v49 = vmul.f32 %v263_v43, %v237_v45  ;;  %v266_v50 = vmul.f32 %v264_v44, %v238_v46  ;;  %vm214_vm2 = vcmp.eq.s32.totalorder %v209_v33, %v213_v48  ;;  %vm215_vm3 = vcmp.eq.s32.totalorder %v210_v39, %v213_v48 }
  0xc6   : > { %v267_v51 = vsel %vm214_vm2, %v445_v14, %v265_v49  ;;  %v268_v52 = vsel %vm215_vm3, %v447_v15, %v266_v50 }
  0xc7   : > { %v270_v53 = vsel %vm269_vm1, %v268_v52, 0.0 }
  0xc8   : > { %v271_v54 = vadd.f32 %v270_v53, %v267_v51 }
  0xca   : > { %v280_v55 = vsel %vm277_vm4, %v271_v54, 0.0 }
  0xcb   : > { %281 = vst [vmem:[%s199_s22] sm:$0xff] %v280_v55 }
  0xcc   : > { %499 = shalt.err (!%p496_p5)
}
  0xcd   : > { %s500_s29 = scalar_lea.hbm %s704_s30, 128  ;;  %s504_s10 = scalar_lea.hbm %s750_s3, 384 }
  0xce   : > { %p501_p7 = scmp.ne.s32.totalorder %s704_s30, %s500_s29  ;;  %p505_p0 = scmp.lt.u32.totalorder %s704_s30, %s750_s3 }
  0xcf   : > { %p506_p2 = scmp.lt.u32.totalorder %s504_s10, %s500_s29  ;;  %p508_p6 = scmp.lt.u32.totalorder %s500_s29, %s704_s30 }
  0xd0   : > { %p502_p8 = pnand %p501_p7, %p759_p11 }
  0xd1   : > { %p507_p10 = por %p506_p2, %p505_p0 }
  0xd2   : > { %p503_p13 = pneg %p502_p8 }
  0xd3   : > { %p509_p12 = por %p508_p6, %p507_p10 }
  0xd5   : > { %p510_p4 = pnand %p509_p12, %p503_p13 }
  0xd7   : > { %513 = shalt.err (!%p510_p4)
}
  0xd8   : > { %397 = dma.vmem_to_hbm [thread:$0]  (%p759_p11), %s706_s26, 128, %s704_s30, %s283_s5  }
  0xd9 PF: > { %p408_p9 = scmp.ge.s32.totalorder %s552_s15, 2  ;;  %s308_s17 = sand.u32 1, %s540_s12  }
  0xda   : > { %p760_p1 = scmp.ne.s32.totalorder %s755_s25, 0  ;;  %s309_s19 = scalar_lea.sflag [#allocation4], %s308_s17 }
  0xdc   : > { %p404_p3 = pnand %p408_p9, %p760_p1 }
  0xde   : > { %535 = dma.done.wait (!%p404_p3), %s309_s19, 128  }
  0xdf   : > { %537 = vsyncadd (!%p404_p3), %s309_s19, 4294967168  ;;  %p16_p5 = scmp.ge.s32.totalorder %s603_s18, 5   ;;  %s761_s12 = smov %s544_s13 }
  0xe0   : > { %s762_s13 = smov %s548_s14  ;;  %s763_s14 = smov %s615_s21 }
  0xe1   : > { %s764_s15 = smov %s603_s18  ;;  %18 = sbr.rel (!%p16_p5) target bundleno = 5 (0x5), region = 80 }
  0xe8   :  { %314 = vsyncpa [#allocation3], 1 }
  0xe9   :  { %316 = vsyncpa [#allocation3 + $0x1], 1 }
  0xea   :  { %317 = vsyncpa [#allocation4], 1 }
  0xeb   :  { %319 = vsyncpa [#allocation4 + $0x1], 1 }

</bundles_post_ra>
